<compile_context>
chip_gen: v5e
topology: v5e:2x2
jax: 0.10.0
libtpu: 0.0.40
codegen_flags: <defaults>
</compile_context>

<pallas_src>
import jax
import jax.numpy as jnp
from jax import lax
from jax.experimental import pallas as pl
from jax.experimental.pallas import tpu as pltpu


def _round_up(x: int, m: int) -> int:
    return (x + m - 1) // m * m


# ---------------------------------------------------------------------------
# Path A: VMEM-resident table, on-chip one-hot MXU gather, lane-dense output.
# ---------------------------------------------------------------------------
def _onehot_gather_kernel(idx_ref, table_ref, out_ref):
    # idx_ref:   (rows, k)         int32  VMEM  packed index tile (k rows / 128 lanes)
    # table_ref: (num_location, D)        VMEM  whole table, resident (constant index_map)
    # out_ref:   (rows, k*D)              VMEM  lane-dense output tile
    rows = out_ref.shape[0]
    num_location, emb_dim = table_ref.shape
    k = out_ref.shape[1] // emb_dim          # rows packed per 128-lane output row

    table = table_ref[...]
    loc_ids = lax.broadcasted_iota(jnp.int32, (rows, num_location), 1)

    # k is a small static int (128 // D); unrolled at trace time.
    for j in range(k):
        tgt = idx_ref[:, j:j + 1]                              # (rows, 1) int32
        onehot = (loc_ids == tgt).astype(table.dtype)          # (rows, num_location)
        emb = jnp.dot(onehot, table,
                      preferred_element_type=jnp.float32,
                      precision=lax.Precision.HIGHEST)         # full-precision f32 gather
        out_ref[:, j * emb_dim:(j + 1) * emb_dim] = emb.astype(out_ref.dtype)


def _forward_vmem_resident(idx, table, n, k, block_rows, vmem_limit):
    num_location, emb_dim = table.shape
    itemsize = jnp.dtype(table.dtype).itemsize
    table_bytes = num_location * emb_dim * itemsize

    # Rows per packed (128-lane) output row block:
    #   * keep the (rows, num_location) one-hot intermediate ~<= 2 MiB,
    #   * keep the resident table + double-buffered idx/out blocks inside the
    #     generation-aware VMEM budget.
    max_rows_onehot = max(8, (1 << 19) // max(num_location, 1))
    per_packed_row = 2 * (k * emb_dim * itemsize + k * 4) + num_location * 4
    avail = max(8 * per_packed_row, int(0.8 * vmem_limit) - 2 * table_bytes)
    max_rows_vmem = max(8, avail // per_packed_row)
    rows_per_block = min(max(1, block_rows // k), max_rows_onehot, max_rows_vmem)
    rows_per_block = max(8, rows_per_block - rows_per_block % 8)

    tm = rows_per_block * k                   # logical embedding rows per grid step
    n_aligned = _round_up(n, 8 * k)
    if n_aligned <= tm:                       # small N: one full-extent block
        tm = n_aligned
        rows_per_block = tm // k

    n_padded = _round_up(n, tm)
    num_blocks = n_padded // tm
    if n_padded != n:
        idx = jnp.pad(idx, (0, n_padded - n))  # pad with row 0; dropped on final slice
    idx2 = idx.reshape(n_padded // k, k)       # idx2[p, j] = idx[p*k + j]

    out = pl.pallas_call(
        _onehot_gather_kernel,
        out_shape=jax.ShapeDtypeStruct((n_padded // k, k * emb_dim), table.dtype),
        grid=(num_blocks,),
        in_specs=[
            pl.BlockSpec((rows_per_block, k), lambda i: (i, 0)),       # idx tile
            pl.BlockSpec((num_location, emb_dim), lambda i: (0, 0)),   # resident table
        ],
        out_specs=pl.BlockSpec((rows_per_block, k * emb_dim), lambda i: (i, 0)),
        compiler_params=pltpu.CompilerParams(
            # TODO(synk): on v7x, CORE_PARALLEL on this axis would engage both TensorCores.
            dimension_semantics=("parallel",),
            vmem_limit_bytes=vmem_limit,
        ),
    )(idx2, table)

    # Lane-dense slab -> (N, D): same row-major bytes, reshape is free.
    return out.reshape(n_padded, emb_dim)[:n]


# ---------------------------------------------------------------------------
# Path B (fallback, large tables): per-row HBM DMA gather, windowed issue/wait.
# ---------------------------------------------------------------------------
def _hbm_row_gather_kernel(idx_ref, table_ref, out_ref, copy_sem):
    # idx_ref:   (tm,)             int32 SMEM  per-block index tile
    # table_ref: (num_location, D)       HBM   never made VMEM resident
    # out_ref:   (tm, D)                 VMEM  output tile
    # copy_sem:  ()                      DMA semaphore shared by all row copies
    tm = out_ref.shape[0]
    window = min(16, tm)                 # bounded number of in-flight row DMAs

    def row_copy(r):
        # Every copy is one (D,) table row -> one output row: identical shape and
        # dtype, so a wait on any such descriptor retires exactly one copy.
        return pltpu.make_async_copy(table_ref.at[idx_ref[r]], out_ref.at[r], copy_sem)

    @pl.loop(0, tm)
    def _issue(r):
        row_copy(r).start()

        @pl.when(r >= window)
        def _():
            row_copy(r - window).wait()

    @pl.loop(tm - window, tm)
    def _drain(r):
        row_copy(r).wait()


def _forward_hbm_gather(idx, table, n, block_rows, vmem_limit):
    num_location, emb_dim = table.shape
    itemsize = jnp.dtype(table.dtype).itemsize

    # Cap the tile so double-buffered (tm, D) output blocks stay inside budget.
    max_tm = max(8, (vmem_limit // 2) // max(1, 2 * emb_dim * itemsize))
    tm = min(block_rows, max_tm)
    if _round_up(n, 8) <= tm:
        tm = _round_up(n, 8)                 # single full-extent block
    else:
        tm = max(128, (tm // 128) * 128)

    n_padded = _round_up(n, tm)
    num_blocks = n_padded // tm
    if n_padded != n:
        idx = jnp.pad(idx, (0, n_padded - n))

    out = pl.pallas_call(
        _hbm_row_gather_kernel,
        out_shape=jax.ShapeDtypeStruct((n_padded, emb_dim), table.dtype),
        grid=(num_blocks,),
        in_specs=[
            pl.BlockSpec((tm,), lambda i: (i,), memory_space=pltpu.MemorySpace.SMEM),
            pl.BlockSpec(memory_space=pl.ANY),            # table stays in HBM
        ],
        out_specs=pl.BlockSpec((tm, emb_dim), lambda i: (i, 0)),
        scratch_shapes=[pltpu.SemaphoreType.DMA(())],
        compiler_params=pltpu.CompilerParams(
            dimension_semantics=("parallel",),
            vmem_limit_bytes=vmem_limit,
        ),
    )(idx, table)
    return out[:n]


# ---------------------------------------------------------------------------
# Wrapper: UserEmbeddingDB.forward
# ---------------------------------------------------------------------------
def user_embedding_db_forward(user_fea, embedding_location, *, block_rows=1024):
    """Pallas equivalent of UserEmbeddingDB.forward.

    user_fea:           (N, num_user_fea) integer features; column 0 = location index
    embedding_location: (num_location, embedding_dim) table (nn.Embedding weight)
    returns:            (N, embedding_dim)
    """
    n = user_fea.shape[0]
    num_location, emb_dim = embedding_location.shape
    itemsize = jnp.dtype(embedding_location.dtype).itemsize

    # Glue (outside the kernel): extract the location column.  Clamp OOB indices
    # (PyTorch nn.Embedding would raise; here they silently map to row 0 / last).
    idx = jnp.clip(user_fea[:, 0].astype(jnp.int32), 0, num_location - 1)

    # Lane-packing factor: fold k = 128 // D embedding rows per 128-lane output
    # row so VMEM stores and the VMEM->HBM writeback are lane-dense.
    if emb_dim < 128 and 128 % emb_dim == 0:
        k = 128 // emb_dim
    else:
        k = 1

    # Generation-aware VMEM budget (v7x: 64 MiB physical; v5e/v6e: 128 MiB).
    try:
        vmem_cap = int(pltpu.get_tpu_info().vmem_capacity_bytes)
    except Exception:
        vmem_cap = 64 * 1024 * 1024
    vmem_limit = min(int(0.75 * vmem_cap), 112 * 1024 * 1024)

    table_bytes = num_location * emb_dim * itemsize
    # Small/medium tables: keep the table VMEM-resident and gather on-chip with
    # one-hot MXU matmuls.  Large tables: fall back to per-row HBM DMA gather.
    # TODO(synk): add a per-row VMEM dynamic-slice path for tables that fit VMEM
    # but whose num_location is too large for the one-hot matmul.
    if num_location <= 2048 and table_bytes <= vmem_limit // 4:
        return _forward_vmem_resident(idx, embedding_location, n, k, block_rows, vmem_limit)
    return _forward_hbm_gather(idx, embedding_location, n, block_rows, vmem_limit)


if __name__ == "__main__":
    # Small config consistent with the module's __init__.
    num_location = 16
    embedding_dim = 32
    num_samples = 8
    num_user_fea = 4

    key = jax.random.PRNGKey(0)
    k_emb, k_fea = jax.random.split(key)

    # nn.Embedding default init: N(0, 1)
    embedding_location = jax.random.normal(
        k_emb, (num_location, embedding_dim), dtype=jnp.float32
    )
    # user features: column 0 is the location index
    user_fea = jax.random.randint(
        k_fea, (num_samples, num_user_fea), 0, num_location, dtype=jnp.int32
    )

    out = user_embedding_db_forward(user_fea, embedding_location)
    out = jax.block_until_ready(out)

    # Reference check (plain JAX gather).
    ref = embedding_location[user_fea[:, 0]]
    assert out.shape == (num_samples, embedding_dim)
    assert out.dtype == embedding_location.dtype
    assert jnp.allclose(out, ref, rtol=1e-5, atol=1e-5), "mismatch vs reference gather"

    print("KERNEL_OK")
</pallas_src>

<mosaic_0001>
module attributes {stable_mosaic.version = 11 : i64} {
  func.func @_onehot_gather_kernel(%arg0: i32, %arg1: memref<8x4xi32, #tpu.memory_space<vmem>>, %arg2: memref<16x32xf32, #tpu.memory_space<vmem>>, %arg3: memref<8x128xf32, #tpu.memory_space<vmem>>) attributes {dimension_semantics = [#tpu.dimension_semantics<parallel>], iteration_bounds = array<i64: 1>, scalar_prefetch = 0 : i64, scratch_operands = 0 : i64, tpu.core_type = #tpu.core_type<tc>, window_params = [{transform_indices = @transform_0, window_bounds = array<i64: 8, 4>}, {pipeline_mode = #tpu.pipeline_mode<synchronous>, transform_indices = @transform_1, window_bounds = array<i64: 16, 32>}, {transform_indices = @transform_2, window_bounds = array<i64: 8, 128>}]} {
    %c0 = arith.constant 0 : index
    %c0_0 = arith.constant 0 : index
    %0 = vector.load %arg2[%c0, %c0_0] : memref<16x32xf32, #tpu.memory_space<vmem>>, vector<16x32xf32>
    %1 = tpu.iota {dimensions = array<i32: 1>} : vector<8x16xi32>
    %c0_1 = arith.constant 0 : index
    %c0_2 = arith.constant 0 : index
    %2 = vector.load %arg1[%c0_1, %c0_2] : memref<8x4xi32, #tpu.memory_space<vmem>>, vector<8x1xi32>
    %3 = vector.broadcast %2 : vector<8x1xi32> to vector<8x16xi32>
    %4 = arith.cmpi eq, %1, %3 : vector<8x16xi32>
    %5 = arith.extui %4 : vector<8x16xi1> to vector<8x16xi32>
    %6 = arith.sitofp %5 : vector<8x16xi32> to vector<8x16xf32>
    %cst = arith.constant dense<0.000000e+00> : vector<8x32xf32>
    %7 = tpu.matmul %6, %0, %cst {dimension_numbers = #tpu.dot_dimension_numbers<[1], [0], [0], [1], [0, 0, 1, 1], [], []>, precision = #tpu.contract_precision<fp32>} : vector<8x16xf32>, vector<16x32xf32>, vector<8x32xf32> -> vector<8x32xf32>
    %c0_3 = arith.constant 0 : index
    %c0_4 = arith.constant 0 : index
    %8 = vector.load %arg3[%c0_3, %c0_4] : memref<8x128xf32, #tpu.memory_space<vmem>>, vector<8x32xf32>
    tpu.vector_store %arg3[%c0_3, %c0_4], %7 {strides = array<i32>} : memref<8x128xf32, #tpu.memory_space<vmem>>, vector<8x32xf32>,
    %c0_5 = arith.constant 0 : index
    %c1 = arith.constant 1 : index
    %9 = vector.load %arg1[%c0_5, %c1] : memref<8x4xi32, #tpu.memory_space<vmem>>, vector<8x1xi32>
    %10 = vector.broadcast %9 : vector<8x1xi32> to vector<8x16xi32>
    %11 = arith.cmpi eq, %1, %10 : vector<8x16xi32>
    %12 = arith.extui %11 : vector<8x16xi1> to vector<8x16xi32>
    %13 = arith.sitofp %12 : vector<8x16xi32> to vector<8x16xf32>
    %cst_6 = arith.constant dense<0.000000e+00> : vector<8x32xf32>
    %14 = tpu.matmul %13, %0, %cst_6 {dimension_numbers = #tpu.dot_dimension_numbers<[1], [0], [0], [1], [0, 0, 1, 1], [], []>, precision = #tpu.contract_precision<fp32>} : vector<8x16xf32>, vector<16x32xf32>, vector<8x32xf32> -> vector<8x32xf32>
    %c0_7 = arith.constant 0 : index
    %c32 = arith.constant 32 : index
    %15 = vector.load %arg3[%c0_7, %c32] : memref<8x128xf32, #tpu.memory_space<vmem>>, vector<8x32xf32>
    tpu.vector_store %arg3[%c0_7, %c32], %14 {strides = array<i32>} : memref<8x128xf32, #tpu.memory_space<vmem>>, vector<8x32xf32>,
    %c0_8 = arith.constant 0 : index
    %c2 = arith.constant 2 : index
    %16 = vector.load %arg1[%c0_8, %c2] : memref<8x4xi32, #tpu.memory_space<vmem>>, vector<8x1xi32>
    %17 = vector.broadcast %16 : vector<8x1xi32> to vector<8x16xi32>
    %18 = arith.cmpi eq, %1, %17 : vector<8x16xi32>
    %19 = arith.extui %18 : vector<8x16xi1> to vector<8x16xi32>
    %20 = arith.sitofp %19 : vector<8x16xi32> to vector<8x16xf32>
    %cst_9 = arith.constant dense<0.000000e+00> : vector<8x32xf32>
    %21 = tpu.matmul %20, %0, %cst_9 {dimension_numbers = #tpu.dot_dimension_numbers<[1], [0], [0], [1], [0, 0, 1, 1], [], []>, precision = #tpu.contract_precision<fp32>} : vector<8x16xf32>, vector<16x32xf32>, vector<8x32xf32> -> vector<8x32xf32>
    %c0_10 = arith.constant 0 : index
    %c64 = arith.constant 64 : index
    %22 = vector.load %arg3[%c0_10, %c64] : memref<8x128xf32, #tpu.memory_space<vmem>>, vector<8x32xf32>
    tpu.vector_store %arg3[%c0_10, %c64], %21 {strides = array<i32>} : memref<8x128xf32, #tpu.memory_space<vmem>>, vector<8x32xf32>,
    %c0_11 = arith.constant 0 : index
    %c3 = arith.constant 3 : index
    %23 = vector.load %arg1[%c0_11, %c3] : memref<8x4xi32, #tpu.memory_space<vmem>>, vector<8x1xi32>
    %24 = vector.broadcast %23 : vector<8x1xi32> to vector<8x16xi32>
    %25 = arith.cmpi eq, %1, %24 : vector<8x16xi32>
    %26 = arith.extui %25 : vector<8x16xi1> to vector<8x16xi32>
    %27 = arith.sitofp %26 : vector<8x16xi32> to vector<8x16xf32>
    %cst_12 = arith.constant dense<0.000000e+00> : vector<8x32xf32>
    %28 = tpu.matmul %27, %0, %cst_12 {dimension_numbers = #tpu.dot_dimension_numbers<[1], [0], [0], [1], [0, 0, 1, 1], [], []>, precision = #tpu.contract_precision<fp32>} : vector<8x16xf32>, vector<16x32xf32>, vector<8x32xf32> -> vector<8x32xf32>
    %c0_13 = arith.constant 0 : index
    %c96 = arith.constant 96 : index
    %29 = vector.load %arg3[%c0_13, %c96] : memref<8x128xf32, #tpu.memory_space<vmem>>, vector<8x32xf32>
    tpu.vector_store %arg3[%c0_13, %c96], %28 {strides = array<i32>} : memref<8x128xf32, #tpu.memory_space<vmem>>, vector<8x32xf32>,
    return
  }
  func.func @transform_0(%arg0: i32) -> (i32, i32) {
    %c0_i32 = arith.constant 0 : i32
    %c0_i32_0 = arith.constant 0 : i32
    return %arg0, %c0_i32 : i32, i32
  }
  func.func @transform_1(%arg0: i32) -> (i32, i32) {
    %c0_i32 = arith.constant 0 : i32
    %c0_i32_0 = arith.constant 0 : i32
    %c0_i32_1 = arith.constant 0 : i32
    return %c0_i32, %c0_i32_0 : i32, i32
  }
  func.func @transform_2(%arg0: i32) -> (i32, i32) {
    %c0_i32 = arith.constant 0 : i32
    %c0_i32_0 = arith.constant 0 : i32
    return %arg0, %c0_i32 : i32, i32
  }
}

</mosaic_0001>

<bundles_post_ra>
// kernel: tpu_custom_call.1
= control target key start
LH: loop header
LB: loop body
LE: loop exit
PB: predicated region body
PF: predicated region fallthrough
CT: control target
= control target key end

     0   :  { %7 = vsyncpa [#allocation3], 0  ;;  %s955_s0 = inlined_call_operand.vmem [shape: s32[8,4], index: 0, kind: input, shape index: {}]   ;;  %s956_s1 = inlined_call_operand.hbm [shape: f32[16,32], index: 1, kind: input, shape index: {}]   ;;  %s957_s2 = inlined_call_operand.hbm [shape: f32[8,128], index: 2, kind: output, shape index: {}]  }
   0x1   :  { %8 = vsyncpa [#allocation4], 0  ;;  %s15_s11 = sshll.u32 %s956_s1, 4  ;;  %s831_s12 = smov [#allocation2]   ;;  %s16_s11 = int_to_ptr.hbm [resolvable:$true] %s15_s11 }
   0x2   :  { %s17_s13 = sshll.u32 %s831_s12, 4  ;;  %s832_s14 = smov 128   ;;  %s18_s13 = int_to_ptr.vmem [resolvable:$true] %s17_s13 }
   0x3   :  { %s833_s15 = smov 8  }
   0x4   :  { %23 = dma.hbm_to_vmem [thread:$0]  %s16_s11, 256, %s18_s13, [#allocation3], %s832_s14, %s832_s14, %s833_s15  }
   0x5   :  { %827 = dma.done.wait [#allocation3], 256  }
   0x6   :  { %828 = vsyncadd [#allocation3], 4294967040  ;;  %v834_v0 = vmov 0   ;;  %v835_v1 = vmov 2   ;;  %v32_v2 = vld [vmem:[%s955_s0] sm:$0xff]  ;;  %v836_v3 = vmov 1   ;;  %v30_v17 = vlaneseq }
   0x7   :  { %774 = vset.pattern.permute.xlu0 %v834_v0  ;;  %776 = vset.pattern.permute.xlu1 %v835_v1  ;;  %v837_v4 = vmov 3   ;;  %v29_v5 = vld [vmem:[#allocation2 + $0x8] sm:$0xff]  ;;  %v28_v7 = vld [vmem:[#allocation2] sm:$0xff]  ;;  %vm39_vm0 = vcmask 130048   ;;  %v838_v20 = vmov 0.0   ;;  %vm202_vm5 = vcmask 261120  }
   0x8   :  { %34 = vperm.xlu0 %774, %v32_v2   ;;  %381 = vperm.xlu1 %776, %v32_v2   ;;  %v864_v6 = vand.u32 4294901760, %v29_v5  ;;  %v869_v9 = vand.u32 4294901760, %v28_v7  ;;  %v31_v18 = vand.u32 127, %v30_v17  ;;  %s839_s0 = smov 32   ;;  %s840_s1 = smov 64   ;;  %vm377_vm6 = vcmask 523520  }
   0x9   :  { %s841_s18 = smov 96   ;;  %vm552_vm7 = vcmask 785920   ;;  %s842_s19 = smov [#allocation5]   ;;  %vm727_vm8 = vcmask 1048320  }
   0xa   :  { %v867_v8 = vsub.f32 %v29_v5, %v864_v6  ;;  %142 = vmatpush.msra.mxu3 %v864_v6  ;;  %58 = vmatpush.msra.mxu0 %v864_v6  ;;  %v877_v11 = vsub.f32 %v28_v7, %v869_v9  ;;  %s734_s20 = sshll.u32 %s842_s19, 4  ;;  %s736_s23 = sshll.u32 %s957_s2, 4  ;;  %s735_s20 = int_to_ptr.vmem [resolvable:$true] %s734_s20  ;;  %s737_s23 = int_to_ptr.hbm [resolvable:$true] %s736_s23 }
   0xc   :  { %v874_v10 = vand.u32 4294901760, %v867_v8  ;;  %117 = vmatpush.msra.mxu2 %v867_v8  ;;  %144 = vmatpush.msra.mxu3 %v869_v9  ;;  %v885_v13 = vand.u32 4294901760, %v877_v11 }
   0xd   :  { %60 = vmatpush.msra.mxu0 %v869_v9 }
   0xe   :  { %v87_v12 = vsub.f32 %v867_v8, %v874_v10  ;;  %120 = vmatpush.msra.mxu2 %v877_v11  ;;  %v93_v15 = vsub.f32 %v877_v11, %v885_v13 }
   0xf   :  { %169 = vmatpush.msrb.mxu0 %v874_v10 }
  0x10   :  { %775 = vset.pattern.permute.xlu0 %v836_v3  ;;  %777 = vset.pattern.permute.xlu1 %v837_v4  ;;  %v890_v14 = vand.u32 4294901760, %v87_v12  ;;  %v897_v16 = vand.u32 4294901760, %v93_v15 }
  0x11   :  { %206 = vperm.xlu0 %775, %v32_v2   ;;  %556 = vperm.xlu1 %777, %v32_v2  }
  0x12   :  { %229 = vmatpush.msrb.mxu2 %v864_v6  ;;  %173 = vmatpush.msrb.mxu0 %v885_v13 }
  0x13   :  { %89 = vmatpush.msra.mxu1 %v890_v14  ;;  %260 = vmatpush.msrb.mxu3 %v890_v14 }
  0x14   :  { %231 = vmatpush.msrb.mxu2 %v869_v9 }
  0x15   :  { %95 = vmatpush.msra.mxu1 %v897_v16  ;;  %266 = vmatpush.msrb.mxu3 %v897_v16 }
  0x17   :  { %194 = vmatpush.msrb.mxu1 %v864_v6 }
  0x19   :  { %778 = vset.pattern.permute.xlu0 %v837_v4  ;;  %196 = vmatpush.msrb.mxu1 %v869_v9 }
  0x7a   :  { %v35_v19 = vpop.permute.xlu0 %34  ;;  %v382_v27 = vpop.permute.xlu1 %381 }
  0x7b   :  { %vm36_vm1 = vcmp.eq.s32.totalorder %v31_v18, %v35_v19  ;;  %vm383_vm3 = vcmp.eq.s32.totalorder %v31_v18, %v382_v27 }
  0x7c   :  { %v746_v21 = vsel %vm36_vm1, 1.0, %v838_v20  ;;  %v754_v33 = vsel %vm383_vm3, 1.0, %v838_v20 }
  0x7d   :  { %747 = vmatmul.msk.f32.vlgmr.msra.gmra.mxu1 %vm39_vm0, %v746_v21  ;;  %v41_v22 = vsel %vm39_vm0, %v746_v21, 0  ;;  %v387_v36 = vsel %vm39_vm0, %v754_v33, 0 }
  0x7e   :  { %v62_v23 = vsub.f32 %v41_v22, %v41_v22  ;;  %313 = vmatpush.msra.mxu1 %v864_v6  ;;  %v408_v38 = vsub.f32 %v387_v36, %v387_v36 }
  0x80   :  { %123 = vmatmul.f32.vlgmr.msra.gmra.mxu2 %v62_v23  ;;  %v63_v24 = vand.u32 4294901760, %v62_v23  ;;  %315 = vmatpush.msra.mxu1 %v869_v9  ;;  %v409_v40 = vand.u32 4294901760, %v408_v38 }
  0x81   :  { %340 = vmatpush.msra.mxu2 %v874_v10 }
  0x82   :  { %148 = vmatmul.f32.vlgmr.msra.gmra.mxu3 %v63_v24  ;;  %v64_v25 = vsub.f32 %v62_v23, %v63_v24  ;;  %v410_v42 = vsub.f32 %v408_v38, %v409_v40 }
  0x83   :  { %v207_v26 = vpop.permute.xlu0 %206  ;;  %365 = vmatpush.msra.mxu3 %v864_v6  ;;  %344 = vmatpush.msra.mxu2 %v885_v13  ;;  %v557_v37 = vpop.permute.xlu1 %556 }
  0x84   :  { %vm208_vm2 = vcmp.eq.s32.totalorder %v31_v18, %v207_v26  ;;  %v65_v28 = vand.u32 4294901760, %v64_v25  ;;  %vm558_vm4 = vcmp.eq.s32.totalorder %v31_v18, %v557_v37  ;;  %v411_v44 = vand.u32 4294901760, %v410_v42 }
  0x85   :  { %v750_v29 = vsel %vm208_vm2, 1.0, %v838_v20  ;;  %749 = vmatmul.msk.f32.vlgmr.msrb.gmra.mxu1 %vm39_vm0, %v746_v21  ;;  %367 = vmatpush.msra.mxu3 %v869_v9  ;;  %v758_v39 = vsel %vm558_vm4, 1.0, %v838_v20 }
  0x86   :  { %v212_v30 = vsel %vm39_vm0, %v750_v29, 0  ;;  %66 = vmatmul.f32.vlgmr.msra.gmra.mxu0 %v65_v28  ;;  %435 = vmatpush.msrb.mxu1 %v890_v14  ;;  %v562_v41 = vsel %vm39_vm0, %v758_v39, 0 }
  0x87   :  { %v233_v31 = vsub.f32 %v212_v30, %v212_v30  ;;  %288 = vmatpush.msra.mxu0 %v867_v8  ;;  %v583_v43 = vsub.f32 %v562_v41, %v562_v41 }
  0x88   :  { %441 = vmatpush.msrb.mxu1 %v897_v16 }
  0x89   :  { %v234_v32 = vand.u32 4294901760, %v233_v31  ;;  %291 = vmatpush.msra.mxu0 %v877_v11  ;;  %v584_v45 = vand.u32 4294901760, %v583_v43 }
  0x8a   :  { %751 = vmatmul.msk.f32.vlgmr.msrb.gmra.mxu3 %vm39_vm0, %v750_v29 }
  0x8b   :  { %v235_v34 = vsub.f32 %v233_v31, %v234_v32  ;;  %488 = vmatpush.msrb.mxu3 %v864_v6  ;;  %v585_v46 = vsub.f32 %v583_v43, %v584_v45 }
  0x8d   :  { %319 = vmatmul.f32.vlgmr.msra.gmra.mxu1 %v234_v32  ;;  %v236_v35 = vand.u32 4294901760, %v235_v34  ;;  %490 = vmatpush.msrb.mxu3 %v869_v9  ;;  %v586_v47 = vand.u32 4294901760, %v585_v46 }
  0x8e   :  { %748 = vmatmul.msk.f32.vlgmr.msrb.gmra.mxu0 %vm39_vm0, %v746_v21  ;;  %540 = vmatpush.msra.mxu1 %v864_v6 }
  0x8f   :  { %237 = vmatmul.f32.vlgmr.msrb.gmra.mxu2 %v236_v35  ;;  %404 = vmatpush.msrb.mxu0 %v864_v6 }
  0x90   :  { %463 = vmatpush.msrb.mxu2 %v867_v8  ;;  %542 = vmatpush.msra.mxu1 %v869_v9 }
  0x91   :  { %406 = vmatpush.msrb.mxu0 %v869_v9 }
  0x92   :  { %753 = vmatmul.msk.f32.vlgmr.msra.gmra.mxu3 %vm39_vm0, %v750_v29  ;;  %466 = vmatpush.msrb.mxu2 %v877_v11 }
  0x93   :  { %610 = vmatpush.msra.mxu3 %v890_v14 }
  0x95   :  { %755 = vmatmul.msk.f32.vlgmr.msrb.gmra.mxu1 %vm39_vm0, %v754_v33  ;;  %616 = vmatpush.msra.mxu3 %v897_v16 }
  0x96   :  { %294 = vmatmul.f32.vlgmr.msra.gmra.mxu0 %v233_v31  ;;  %663 = vmatpush.msrb.mxu1 %v864_v6 }
  0x97   :  { %752 = vmatmul.msk.f32.vlgmr.msra.gmra.mxu2 %vm39_vm0, %v750_v29  ;;  %515 = vmatpush.msra.mxu0 %v874_v10 }
  0x98   :  { %579 = vmatpush.msra.mxu2 %v864_v6  ;;  %665 = vmatpush.msrb.mxu1 %v869_v9 }
  0x99   :  { %519 = vmatpush.msra.mxu0 %v885_v13 }
  0x9a   :  { %494 = vmatmul.f32.vlgmr.msrb.gmra.mxu3 %v409_v40  ;;  %581 = vmatpush.msra.mxu2 %v869_v9 }
  0x9b   :  { %715 = vmatpush.msrb.mxu3 %v864_v6 }
  0x9d   :  { %757 = vmatmul.msk.f32.vlgmr.msra.gmra.mxu1 %vm39_vm0, %v754_v33  ;;  %717 = vmatpush.msrb.mxu3 %v869_v9 }
  0x9e   :  { %412 = vmatmul.f32.vlgmr.msrb.gmra.mxu0 %v411_v44 }
  0x9f   :  { %469 = vmatmul.f32.vlgmr.msrb.gmra.mxu2 %v408_v38  ;;  %638 = vmatpush.msrb.mxu0 %v867_v8 }
  0xa0   :  { %690 = vmatpush.msrb.mxu2 %v874_v10 }
  0xa1   :  { %641 = vmatpush.msrb.mxu0 %v877_v11 }
  0xa2   :  { %759 = vmatmul.msk.f32.vlgmr.msra.gmra.mxu3 %vm39_vm0, %v758_v39  ;;  %694 = vmatpush.msrb.mxu2 %v885_v13 }
  0xa5   :  { %669 = vmatmul.f32.vlgmr.msrb.gmra.mxu1 %v584_v45 }
  0xa6   :  { %756 = vmatmul.msk.f32.vlgmr.msra.gmra.mxu0 %vm39_vm0, %v754_v33 }
  0xa7   :  { %587 = vmatmul.f32.vlgmr.msra.gmra.mxu2 %v586_v47 }
  0xaa   :  { %761 = vmatmul.msk.f32.vlgmr.msrb.gmra.mxu3 %vm39_vm0, %v758_v39 }
  0xae   :  { %644 = vmatmul.f32.vlgmr.msrb.gmra.mxu0 %v583_v43 }
  0xaf   :  { %760 = vmatmul.msk.f32.vlgmr.msrb.gmra.mxu2 %vm39_vm0, %v758_v39 }
  0xfa   :  { %v98_v48 = vpop.f32.mrf.mxu1 }
 0x102   :  { %v199_v54 = vpop.f32.mrf.mxu1 }
 0x103   :  { %v67_v49 = vpop.f32.mrf.mxu0  ;;  %v124_v51 = vpop.f32.mrf.mxu2 }
 0x104   :  { %v99_v50 = vadd.f32 %v98_v48, %v67_v49 }
 0x105   :  { %v149_v52 = vpop.f32.mrf.mxu3 }
 0x106   :  { %v125_v53 = vadd.f32 %v124_v51, %v99_v50 }
 0x108   :  { %v150_v55 = vadd.f32 %v149_v52, %v125_v53 }
 0x10a   :  { %v320_v60 = vpop.f32.mrf.mxu1 }
 0x10b   :  { %v176_v56 = vpop.f32.mrf.mxu0 }
 0x10c   :  { %v177_v57 = vadd.f32 %v176_v56, %v150_v55 }
 0x10d   :  { %v269_v58 = vpop.f32.mrf.mxu3 }
 0x10e   :  { %v200_v59 = vadd.f32 %v199_v54, %v177_v57 }
 0x110   :  { %203 = vst.msk [vmem:[#allocation5] sm:$0xff] %vm202_vm5, %v200_v59 }
 0x112   :  { %v238_v61 = vpop.f32.mrf.mxu2  ;;  %v444_v6 = vpop.f32.mrf.mxu1 }
 0x113   :  { %v270_v62 = vadd.f32 %v269_v58, %v238_v61  ;;  %v295_v63 = vpop.f32.mrf.mxu0 }
 0x115   :  { %v296_v0 = vadd.f32 %v295_v63, %v270_v62  ;;  %v370_v1 = vpop.f32.mrf.mxu3 }
 0x117   :  { %v321_v2 = vadd.f32 %v320_v60, %v296_v0 }
 0x11a   :  { %v347_v3 = vpop.f32.mrf.mxu2  ;;  %v545_v14 = vpop.f32.mrf.mxu1 }
 0x11b   :  { %v348_v4 = vadd.f32 %v347_v3, %v321_v2  ;;  %v413_v5 = vpop.f32.mrf.mxu0 }
 0x11c   :  { %v445_v9 = vadd.f32 %v444_v6, %v413_v5 }
 0x11d   :  { %v371_v7 = vadd.f32 %v370_v1, %v348_v4  ;;  %v495_v8 = vpop.f32.mrf.mxu3 }
 0x11f   :  { %374 = vrot.lane.b32.xlu2 %v371_v7, %s839_s0 }
 0x122   :  { %v470_v10 = vpop.f32.mrf.mxu2  ;;  %v670_v22 = vpop.f32.mrf.mxu1 }
 0x123   :  { %v471_v11 = vadd.f32 %v470_v10, %v445_v9  ;;  %v522_v12 = vpop.f32.mrf.mxu0 }
 0x125   :  { %v496_v13 = vadd.f32 %v495_v8, %v471_v11  ;;  %v619_v17 = vpop.f32.mrf.mxu3 }
 0x127   :  { %v523_v15 = vadd.f32 %v522_v12, %v496_v13 }
 0x129   :  { %v546_v16 = vadd.f32 %v545_v14, %v523_v15 }
 0x12a   :  { %v588_v18 = vpop.f32.mrf.mxu2 }
 0x12b   :  { %v620_v19 = vadd.f32 %v619_v17, %v588_v18  ;;  %v645_v20 = vpop.f32.mrf.mxu0  ;;  %549 = vrot.lane.b32.xlu2 %v546_v16, %s840_s1 }
 0x12d   :  { %v646_v21 = vadd.f32 %v645_v20, %v620_v19  ;;  %v720_v26 = vpop.f32.mrf.mxu3 }
 0x12f   :  { %v671_v23 = vadd.f32 %v670_v22, %v646_v21 }
 0x132   :  { %v697_v24 = vpop.f32.mrf.mxu2 }
 0x133   :  { %v698_v25 = vadd.f32 %v697_v24, %v671_v23 }
 0x135   :  { %v721_v27 = vadd.f32 %v720_v26, %v698_v25 }
 0x137   :  { %724 = vrot.lane.b32.xlu1 %v721_v27, %s841_s18 }
 0x179   :  { %v375_v28 = vpop.permute.xlu2 %374 }
 0x17a   :  { %378 = vst.msk [vmem:[#allocation5] sm:$0xff] %vm377_vm6, %v375_v28 }
 0x185   :  { %v550_v29 = vpop.permute.xlu2 %549 }
 0x186   :  { %553 = vst.msk [vmem:[#allocation5] sm:$0xff] %vm552_vm7, %v550_v29 }
 0x1a9   :  { %v725_v30 = vpop.permute.xlu1 %724 }
 0x1aa   :  { %728 = vst.msk [vmem:[#allocation5] sm:$0xff] %vm727_vm8, %v725_v30 }
 0x1ab   :  { %739 = dma.vmem_to_hbm [thread:$0]  %s735_s20, 128, %s737_s23, [#allocation4]  }
 0x1ac   :  { %829 = dma.done.wait [#allocation4], 128  }
 0x1ad   :  { %830 = vsyncadd [#allocation4], 4294967168 }
 0x1ae   :  { %744 = vsyncpa [#allocation3], 1 }
 0x1af   :  { %745 = vsyncpa [#allocation4], 1 }

</bundles_post_ra>
